<compile_context>
chip_gen: v7x
topology: tpu7x:2x2x1
jax: 0.10.0
libtpu: 0.0.40
codegen_flags: <defaults>
</compile_context>

<pallas_src>
import jax
import jax.numpy as jnp
from jax import lax
from jax.experimental import pallas as pl
from jax.experimental.pallas import tpu as pltpu


OC = 16        # Conv3d out_channels
KSIZE = 4      # Conv3d kernel_size
STRIDE = 2     # Conv3d stride


# ----------------------------- Pallas kernel ------------------------------ #
def _conv3d_bias_relu_kernel(x_ref, sd_ref, b_ref, bias_ref, o_ref):
    """Direct conv3d(1->16, k=4, s=2) + bias + ReLU for one (batch, Do-tile).

    x_ref   : (D, H*W)            f32  -- full input volume of this batch elt
    sd_ref  : (Kd, do_tile, D)    bf16 -- 0/1 depth-selection rows
    b_ref   : (Kd, H*W, M)        bf16 -- weight-folded H/W/OC operator
    bias_ref: (1, M)              f32
    o_ref   : (do_tile, M)        f32,  M = OC*Ho*Wo
    """
    xv = x_ref[...].astype(jnp.bfloat16)                     # cast in-kernel
    acc = jnp.zeros(o_ref.shape, jnp.float32)
    for kd in range(sd_ref.shape[0]):                        # Kd = 4, unrolled
        # Gather the strided depth rows x[s*do + kd, :, :] via a 0/1 matmul.
        rows = jnp.dot(sd_ref[kd], xv,
                       preferred_element_type=jnp.float32)   # (do_tile, H*W)
        # Apply all (kh, kw) taps and the OC mix in one MXU matmul.
        acc = acc + jnp.dot(rows.astype(jnp.bfloat16), b_ref[kd],
                            preferred_element_type=jnp.float32)  # (do_tile, M)
    o_ref[...] = jnp.maximum(acc + bias_ref[...], 0.0).astype(o_ref.dtype)


# ----------------------------- host-side prep ------------------------------ #
def _selection(axis_size, k, out_size, stride):
    """S[kk, oo, a] = 1 iff a == stride*oo + kk ; shape (k, out_size, axis)."""
    a = jnp.arange(axis_size)[None, None, :]
    kk = jnp.arange(k)[:, None, None]
    oo = jnp.arange(out_size)[None, :, None]
    return (a == stride * oo + kk).astype(jnp.float32)


def _pick_do_tile(do):
    """Largest multiple-of-8 exact divisor of Do giving >=2 tiles, else Do."""
    cands = [t for t in range(8, do + 1, 8) if do % t == 0 and do // t >= 2]
    return max(cands) if cands else do


def _conv3d_relu_pallas(x3, sd, bop, bias_row, do_tile):
    """x3: (N, D, H*W) f32; sd: (Kd, Do, D) bf16; bop: (Kd, H*W, M) bf16;
    bias_row: (1, M) f32.  Returns (N, Do, M) f32."""
    n, d, hw = x3.shape
    kdim, _, m = bop.shape
    do = sd.shape[1]
    n_do = do // do_tile
    grid = (n, n_do)

    cost = pl.CostEstimate(
        flops=2 * n * kdim * do * hw * (d + m),
        transcendentals=0,
        bytes_accessed=(x3.size * 4 + sd.size * 2 + bop.size * 2
                        + bias_row.size * 4 + n * do * m * 4),
    )

    return pl.pallas_call(
        _conv3d_bias_relu_kernel,
        out_shape=jax.ShapeDtypeStruct((n, do, m), jnp.float32),
        grid_spec=pltpu.PrefetchScalarGridSpec(
            num_scalar_prefetch=0,
            grid=grid,
            in_specs=[
                # Full per-batch input volume; constant across the Do axis so
                # it is fetched only when the batch index changes.
                pl.BlockSpec((None, d, hw), lambda b, j: (b, 0, 0)),
                # Depth-selection rows for this Do tile.
                pl.BlockSpec((kdim, do_tile, d), lambda b, j: (0, j, 0)),
                # Weight-folded operator + bias row: resident (constant index).
                pl.BlockSpec((kdim, hw, m), lambda b, j: (0, 0, 0)),
                pl.BlockSpec((1, m), lambda b, j: (0, 0)),
            ],
            out_specs=pl.BlockSpec((None, do_tile, m), lambda b, j: (b, j, 0)),
        ),
        compiler_params=pltpu.CompilerParams(
            dimension_semantics=("parallel", "parallel"),
            vmem_limit_bytes=32 * 1024 * 1024,
        ),
        cost_estimate=cost,
    )(x3, sd, bop, bias_row)


# ----------------------------- Encoder wrapper ----------------------------- #
@jax.jit
def encoder_forward(x, weight, bias):
    """Replicates Encoder.forward. x: (N, 1, D, H, W) f32, NCDHW.

    Returns (x1, p1), each (N, 16, Do, Ho, Wo) f32."""
    k, s = KSIZE, STRIDE
    n, c, d, h, w = x.shape
    assert c == 1 and weight.shape[1] == 1, "Encoder.conv1 has in_channels=1"
    oc = weight.shape[0]
    do = (d - k) // s + 1
    ho = (h - k) // s + 1
    wo = (w - k) // s + 1
    m = oc * ho * wo

    # Weight-only operators (depend on weights/shapes, not on x); in a real
    # pipeline these are precomputed once per weight update.
    sd = _selection(d, k, do, s).astype(jnp.bfloat16)            # (Kd, Do, D)
    sh = _selection(h, k, ho, s)                                 # (Kh, Ho, H)
    sw = _selection(w, k, wo, s)                                 # (Kw, Wo, W)
    wm = weight.reshape(oc, k, k, k).astype(jnp.float32)
    # B[kd, hh, ww, oc, ho, wo] = sum_{kh,kw} w[oc,kd,kh,kw]*1[hh=s*ho+kh]*1[ww=s*wo+kw]
    bop = jnp.einsum('oabc,bph,cqw->ahwopq', wm, sh, sw)
    bop = bop.reshape(k, h * w, m).astype(jnp.bfloat16)          # (Kd, H*W, M)
    bias_row = jnp.repeat(bias.astype(jnp.float32), ho * wo).reshape(1, m)

    # Pure row-major reshape (no copy, no im2col expansion).
    x3 = x.reshape(n, d, h * w)

    do_tile = _pick_do_tile(do)
    out = _conv3d_relu_pallas(x3, sd, bop, bias_row, do_tile)    # (N, Do, M)

    # Compact output -> NCDHW (small host transpose; no padded slice pass).
    x1 = out.reshape(n, do, oc, ho, wo).transpose(0, 2, 1, 3, 4)
    p1 = x1  # MaxPool3d(kernel_size=1, stride=1) is the identity.
    return x1, p1


# --------------------------------- main ------------------------------------ #
if __name__ == "__main__":
    key = jax.random.PRNGKey(0)
    kx, kw, kb, kx2 = jax.random.split(key, 4)

    # Deterministic synthetic Conv3d(1, 16, k=4) parameters.
    weight = 0.1 * jax.random.normal(kw, (16, 1, 4, 4, 4), dtype=jnp.float32)
    bias = 0.1 * jax.random.normal(kb, (16,), dtype=jnp.float32)

    def reference(xin):
        r = lax.conv_general_dilated(
            xin, weight, window_strides=(2, 2, 2), padding="VALID",
            dimension_numbers=("NCDHW", "OIDHW", "NCDHW"),
            precision=lax.Precision.HIGHEST)
        return jnp.maximum(r + bias.reshape(1, -1, 1, 1, 1), 0.0)

    # Primary small example (batch=2), consistent with the module's NCDHW,
    # C=1 input with a last spatial dim of 4 (like the spec's 84x84x4).
    x = jax.random.normal(kx, (2, 1, 16, 16, 4), dtype=jnp.float32)
    x1, p1 = encoder_forward(x, weight, bias)
    jax.block_until_ready((x1, p1))
    ref = reference(x)
    assert x1.shape == (2, 16, 7, 7, 1), x1.shape
    assert p1.shape == x1.shape
    err = float(jnp.max(jnp.abs(x1 - ref)))
    assert jnp.allclose(x1, ref, atol=5e-2, rtol=5e-2), err
    assert jnp.array_equal(p1, x1)          # MaxPool3d(1,1) identity

    # Second shape: exercises the Do-tiled grid (grid=(1, 2)) and the N=1 path.
    x2 = jax.random.normal(kx2, (1, 1, 34, 34, 4), dtype=jnp.float32)
    y1, q1 = encoder_forward(x2, weight, bias)
    jax.block_until_ready((y1, q1))
    ref2 = reference(x2)
    assert y1.shape == (1, 16, 16, 16, 1), y1.shape
    err2 = float(jnp.max(jnp.abs(y1 - ref2)))
    assert jnp.allclose(y1, ref2, atol=5e-2, rtol=5e-2), err2
    assert jnp.array_equal(q1, y1)

    print("KERNEL_OK")
</pallas_src>

<mosaic_0001>
module attributes {stable_mosaic.version = 11 : i64} {
  func.func @_conv3d_bias_relu_kernel(%arg0: i32, %arg1: i32, %arg2: memref<1x16x64xf32, #tpu.memory_space<vmem>>, %arg3: memref<4x7x16xbf16, #tpu.memory_space<vmem>>, %arg4: memref<4x64x112xbf16, #tpu.memory_space<vmem>>, %arg5: memref<1x112xf32, #tpu.memory_space<vmem>>, %arg6: memref<1x7x112xf32, #tpu.memory_space<vmem>>) attributes {dimension_semantics = [#tpu.dimension_semantics<parallel>, #tpu.dimension_semantics<parallel>], iteration_bounds = array<i64: 2, 1>, scalar_prefetch = 0 : i64, scratch_operands = 0 : i64, tpu.core_type = #tpu.core_type<tc>, window_params = [{transform_indices = @transform_0, window_bounds = array<i64: 1, 16, 64>}, {transform_indices = @transform_1, window_bounds = array<i64: 4, 7, 16>}, {pipeline_mode = #tpu.pipeline_mode<synchronous>, transform_indices = @transform_2, window_bounds = array<i64: 4, 64, 112>}, {pipeline_mode = #tpu.pipeline_mode<synchronous>, transform_indices = @transform_3, window_bounds = array<i64: 1, 112>}, {transform_indices = @transform_4, window_bounds = array<i64: 1, 7, 112>}]} {
    %c0 = arith.constant 0 : index
    %c0_0 = arith.constant 0 : index
    %c0_1 = arith.constant 0 : index
    %0 = vector.load %arg2[%c0, %c0_0, %c0_1] : memref<1x16x64xf32, #tpu.memory_space<vmem>>, vector<1x16x64xf32>
    %1 = vector.shape_cast %0 : vector<1x16x64xf32> to vector<16x64xf32>
    %2 = arith.truncf %1 : vector<16x64xf32> to vector<16x64xbf16>
    %cst = arith.constant 0.000000e+00 : f32
    %3 = vector.broadcast %cst : f32 to vector<7x112xf32>
    %c0_2 = arith.constant 0 : index
    %c0_3 = arith.constant 0 : index
    %c0_4 = arith.constant 0 : index
    %4 = vector.load %arg3[%c0_2, %c0_3, %c0_4] : memref<4x7x16xbf16, #tpu.memory_space<vmem>>, vector<1x7x16xbf16>
    %5 = vector.shape_cast %4 : vector<1x7x16xbf16> to vector<7x16xbf16>
    %cst_5 = arith.constant dense<0.000000e+00> : vector<7x64xf32>
    %6 = tpu.matmul %5, %2, %cst_5 {dimension_numbers = #tpu.dot_dimension_numbers<[1], [0], [0], [1], [0, 0, 1, 1], [], []>} : vector<7x16xbf16>, vector<16x64xbf16>, vector<7x64xf32> -> vector<7x64xf32>
    %7 = arith.truncf %6 : vector<7x64xf32> to vector<7x64xbf16>
    %c0_6 = arith.constant 0 : index
    %c0_7 = arith.constant 0 : index
    %c0_8 = arith.constant 0 : index
    %8 = vector.load %arg4[%c0_6, %c0_7, %c0_8] : memref<4x64x112xbf16, #tpu.memory_space<vmem>>, vector<1x64x112xbf16>
    %9 = vector.shape_cast %8 : vector<1x64x112xbf16> to vector<64x112xbf16>
    %cst_9 = arith.constant dense<0.000000e+00> : vector<7x112xf32>
    %10 = tpu.matmul %7, %9, %cst_9 {dimension_numbers = #tpu.dot_dimension_numbers<[1], [0], [0], [1], [0, 0, 1, 1], [], []>} : vector<7x64xbf16>, vector<64x112xbf16>, vector<7x112xf32> -> vector<7x112xf32>
    %11 = arith.addf %3, %10 : vector<7x112xf32>
    %c1 = arith.constant 1 : index
    %c0_10 = arith.constant 0 : index
    %c0_11 = arith.constant 0 : index
    %12 = vector.load %arg3[%c1, %c0_10, %c0_11] : memref<4x7x16xbf16, #tpu.memory_space<vmem>>, vector<1x7x16xbf16>
    %13 = vector.shape_cast %12 : vector<1x7x16xbf16> to vector<7x16xbf16>
    %cst_12 = arith.constant dense<0.000000e+00> : vector<7x64xf32>
    %14 = tpu.matmul %13, %2, %cst_12 {dimension_numbers = #tpu.dot_dimension_numbers<[1], [0], [0], [1], [0, 0, 1, 1], [], []>} : vector<7x16xbf16>, vector<16x64xbf16>, vector<7x64xf32> -> vector<7x64xf32>
    %15 = arith.truncf %14 : vector<7x64xf32> to vector<7x64xbf16>
    %c1_13 = arith.constant 1 : index
    %c0_14 = arith.constant 0 : index
    %c0_15 = arith.constant 0 : index
    %16 = vector.load %arg4[%c1_13, %c0_14, %c0_15] : memref<4x64x112xbf16, #tpu.memory_space<vmem>>, vector<1x64x112xbf16>
    %17 = vector.shape_cast %16 : vector<1x64x112xbf16> to vector<64x112xbf16>
    %cst_16 = arith.constant dense<0.000000e+00> : vector<7x112xf32>
    %18 = tpu.matmul %15, %17, %cst_16 {dimension_numbers = #tpu.dot_dimension_numbers<[1], [0], [0], [1], [0, 0, 1, 1], [], []>} : vector<7x64xbf16>, vector<64x112xbf16>, vector<7x112xf32> -> vector<7x112xf32>
    %19 = arith.addf %11, %18 : vector<7x112xf32>
    %c2 = arith.constant 2 : index
    %c0_17 = arith.constant 0 : index
    %c0_18 = arith.constant 0 : index
    %20 = vector.load %arg3[%c2, %c0_17, %c0_18] : memref<4x7x16xbf16, #tpu.memory_space<vmem>>, vector<1x7x16xbf16>
    %21 = vector.shape_cast %20 : vector<1x7x16xbf16> to vector<7x16xbf16>
    %cst_19 = arith.constant dense<0.000000e+00> : vector<7x64xf32>
    %22 = tpu.matmul %21, %2, %cst_19 {dimension_numbers = #tpu.dot_dimension_numbers<[1], [0], [0], [1], [0, 0, 1, 1], [], []>} : vector<7x16xbf16>, vector<16x64xbf16>, vector<7x64xf32> -> vector<7x64xf32>
    %23 = arith.truncf %22 : vector<7x64xf32> to vector<7x64xbf16>
    %c2_20 = arith.constant 2 : index
    %c0_21 = arith.constant 0 : index
    %c0_22 = arith.constant 0 : index
    %24 = vector.load %arg4[%c2_20, %c0_21, %c0_22] : memref<4x64x112xbf16, #tpu.memory_space<vmem>>, vector<1x64x112xbf16>
    %25 = vector.shape_cast %24 : vector<1x64x112xbf16> to vector<64x112xbf16>
    %cst_23 = arith.constant dense<0.000000e+00> : vector<7x112xf32>
    %26 = tpu.matmul %23, %25, %cst_23 {dimension_numbers = #tpu.dot_dimension_numbers<[1], [0], [0], [1], [0, 0, 1, 1], [], []>} : vector<7x64xbf16>, vector<64x112xbf16>, vector<7x112xf32> -> vector<7x112xf32>
    %27 = arith.addf %19, %26 : vector<7x112xf32>
    %c3 = arith.constant 3 : index
    %c0_24 = arith.constant 0 : index
    %c0_25 = arith.constant 0 : index
    %28 = vector.load %arg3[%c3, %c0_24, %c0_25] : memref<4x7x16xbf16, #tpu.memory_space<vmem>>, vector<1x7x16xbf16>
    %29 = vector.shape_cast %28 : vector<1x7x16xbf16> to vector<7x16xbf16>
    %cst_26 = arith.constant dense<0.000000e+00> : vector<7x64xf32>
    %30 = tpu.matmul %29, %2, %cst_26 {dimension_numbers = #tpu.dot_dimension_numbers<[1], [0], [0], [1], [0, 0, 1, 1], [], []>} : vector<7x16xbf16>, vector<16x64xbf16>, vector<7x64xf32> -> vector<7x64xf32>
    %31 = arith.truncf %30 : vector<7x64xf32> to vector<7x64xbf16>
    %c3_27 = arith.constant 3 : index
    %c0_28 = arith.constant 0 : index
    %c0_29 = arith.constant 0 : index
    %32 = vector.load %arg4[%c3_27, %c0_28, %c0_29] : memref<4x64x112xbf16, #tpu.memory_space<vmem>>, vector<1x64x112xbf16>
    %33 = vector.shape_cast %32 : vector<1x64x112xbf16> to vector<64x112xbf16>
    %cst_30 = arith.constant dense<0.000000e+00> : vector<7x112xf32>
    %34 = tpu.matmul %31, %33, %cst_30 {dimension_numbers = #tpu.dot_dimension_numbers<[1], [0], [0], [1], [0, 0, 1, 1], [], []>} : vector<7x64xbf16>, vector<64x112xbf16>, vector<7x112xf32> -> vector<7x112xf32>
    %35 = arith.addf %27, %34 : vector<7x112xf32>
    %c0_31 = arith.constant 0 : index
    %c0_32 = arith.constant 0 : index
    %36 = vector.load %arg5[%c0_31, %c0_32] : memref<1x112xf32, #tpu.memory_space<vmem>>, vector<1x112xf32>
    %37 = vector.broadcast %36 : vector<1x112xf32> to vector<7x112xf32>
    %38 = arith.addf %35, %37 : vector<7x112xf32>
    %cst_33 = arith.constant 0.000000e+00 : f32
    %39 = vector.broadcast %cst_33 : f32 to vector<7x112xf32>
    %40 = arith.maximumf %38, %39 : vector<7x112xf32>
    %c0_34 = arith.constant 0 : index
    %c0_35 = arith.constant 0 : index
    %c0_36 = arith.constant 0 : index
    %41 = vector.load %arg6[%c0_34, %c0_35, %c0_36] : memref<1x7x112xf32, #tpu.memory_space<vmem>>, vector<1x7x112xf32>
    %42 = vector.shape_cast %41 : vector<1x7x112xf32> to vector<7x112xf32>
    %43 = vector.shape_cast %40 : vector<7x112xf32> to vector<1x7x112xf32>
    tpu.vector_store %arg6[%c0_34, %c0_35, %c0_36], %43 {strides = array<i32>} : memref<1x7x112xf32, #tpu.memory_space<vmem>>, vector<1x7x112xf32>,
    return
  }
  func.func @transform_0(%arg0: i32, %arg1: i32) -> (i32, i32, i32) {
    %c0_i32 = arith.constant 0 : i32
    %c0_i32_0 = arith.constant 0 : i32
    %c0_i32_1 = arith.constant 0 : i32
    return %arg0, %c0_i32, %c0_i32_0 : i32, i32, i32
  }
  func.func @transform_1(%arg0: i32, %arg1: i32) -> (i32, i32, i32) {
    %c0_i32 = arith.constant 0 : i32
    %c0_i32_0 = arith.constant 0 : i32
    %c0_i32_1 = arith.constant 0 : i32
    return %c0_i32, %arg1, %c0_i32_0 : i32, i32, i32
  }
  func.func @transform_2(%arg0: i32, %arg1: i32) -> (i32, i32, i32) {
    %c0_i32 = arith.constant 0 : i32
    %c0_i32_0 = arith.constant 0 : i32
    %c0_i32_1 = arith.constant 0 : i32
    %c0_i32_2 = arith.constant 0 : i32
    return %c0_i32, %c0_i32_0, %c0_i32_1 : i32, i32, i32
  }
  func.func @transform_3(%arg0: i32, %arg1: i32) -> (i32, i32) {
    %c0_i32 = arith.constant 0 : i32
    %c0_i32_0 = arith.constant 0 : i32
    %c0_i32_1 = arith.constant 0 : i32
    return %c0_i32, %c0_i32_0 : i32, i32
  }
  func.func @transform_4(%arg0: i32, %arg1: i32) -> (i32, i32, i32) {
    %c0_i32 = arith.constant 0 : i32
    %c0_i32_0 = arith.constant 0 : i32
    return %arg0, %arg1, %c0_i32 : i32, i32, i32
  }
}

</mosaic_0001>

<bundles_post_ra>
// kernel: encoder_forward.1
= control target key start
LH: loop header
LB: loop body
LE: loop exit
PB: predicated region body
PF: predicated region fallthrough
CT: control target
= control target key end

     0   :  { %s1082_s15 = smov 0   ;;  %s1084_s16 = smov 0   ;;  %s1226_s0 = inlined_call_operand.vmem [shape: f32[2,16,64], index: 0, kind: input, shape index: {}]   ;;  %s1227_s1 = inlined_call_operand.vmem [shape: bf16[4,7,16], index: 1, kind: input, shape index: {}]   ;;  %s1228_s2 = inlined_call_operand.vmem [shape: bf16[4,64,112], index: 2, kind: input, shape index: {}]   ;;  %s1229_s3 = inlined_call_operand.vmem [shape: f32[1,112], index: 3, kind: input, shape index: {}]   ;;  %s1230_s4 = inlined_call_operand.vmem [shape: f32[2,7,112], index: 4, kind: output, shape index: {}]  }
   0x1   :  { %s1086_s17 = smov 0  }
   0x2 LB: > { %s26_s18 = sadd.s32 1, %s1049_s16  ;;  %p830_p0 = scmp.ge.s32.totalorder %s1053_s17, 1  ;;  %s1053_s17 = sphi %s1086_s17, %s14_s17   ;;  %s1049_s16 = sphi %s1084_s16, %s1232_s16   ;;  %s1045_s15 = sphi %s1082_s15, %s1231_s15  }
   0x3   : > { %p28_p1 = scmp.ge.s32.totalorder %s26_s18, 2  ;;  %p185_p2 = scmp.lt.s32.totalorder %s1053_s17, 3 }
   0x5   : > { %s1234_s18 = smov (%p28_p1, %s26_s18), 0  ;;  %p186_p3 = pnand %p830_p0, %p185_p2 }
   0x6   : > { %p217_p4 = scmp.lt.s32.totalorder (!%p186_p3), %s1045_s15, 1  ;;  %v1055_v0 = vmov (!%p186_p3), 0.0   ;;  %vm1056_vm0 = vmmov (!%p186_p3), 0   ;;  %v237_v4 = vld [vmem:[%s1227_s1] sm:$0xf] (!%p186_p3)  ;;  %vm238_vm1 = vcmask (!%p186_p3), 130048  }
   0x7   : > { %189 = sbr.rel (%p186_p3) target bundleno = 680 (0x2a8), region = 36  ;;  %917 = vmatprep.subr.bf16.mxu0 (!%p186_p3), %v1055_v0  ;;  %923 = vmatprep.subr.bf16.mxu1 (!%p186_p3), %v1055_v0  ;;  %v835_v5 = vld [vmem:[%s1227_s1 + $0x4] sm:$0xf] (!%p186_p3)  ;;  %v1017_v8 = vld [vmem:[%s1228_s2 + $0x8] sm:$0xff] (!%p186_p3)   ;;  %v1019_v10 = vld [vmem:[%s1228_s2 + $0x10] sm:$0xff] (!%p186_p3)   ;;  %vm370_vm2 = vcmask (!%p186_p3), 523264  }
   0x8   : > { %919 = vmatprep.mubr.msk.bf16.mxu0 (!%p186_p3), %vm1056_vm0, %v1055_v0  ;;  %925 = vmatprep.mubr.msk.bf16.mxu1 (!%p186_p3), %vm1056_vm0, %v1055_v0  ;;  %v1015_v6 = vld [vmem:[%s1228_s2] sm:$0xff] (!%p186_p3)   ;;  %v1018_v9 = vld [vmem:[%s1228_s2 + $0x28] sm:$0xff] (!%p186_p3)   ;;  %v1020_v11 = vld [vmem:[%s1228_s2 + $0x30] sm:$0xff] (!%p186_p3)   ;;  %vm736_vm3 = vcmask (!%p186_p3), 915456  }
   0x9   : > { %v1016_v7 = vld [vmem:[%s1228_s2 + $0x20] sm:$0xff] (!%p186_p3)   ;;  %v1021_v12 = vld [vmem:[%s1228_s2 + $0x18] sm:$0xff] (!%p186_p3)   ;;  %v855_v24 = vld [vmem:[%s1227_s1 + $0x8] sm:$0xf] (!%p186_p3) }
   0xa   : > { %v1022_v13 = vld [vmem:[%s1228_s2 + $0x38] sm:$0xff] (!%p186_p3)   ;;  %v870_v25 = vld [vmem:[%s1227_s1 + $0xc] sm:$0xf] (!%p186_p3)  ;;  %v1023_v26 = vld [vmem:[%s1228_s2 + $0x40] sm:$0xff] (!%p186_p3)  }
   0xb   : > { %v1024_v27 = vld [vmem:[%s1228_s2 + $0x60] sm:$0xff] (!%p186_p3)   ;;  %v1025_v28 = vld [vmem:[%s1228_s2 + $0x48] sm:$0xff] (!%p186_p3)   ;;  %v1027_v30 = vld [vmem:[%s1228_s2 + $0x50] sm:$0xff] (!%p186_p3)  }
   0xc   : > { %v1026_v29 = vld [vmem:[%s1228_s2 + $0x68] sm:$0xff] (!%p186_p3)   ;;  %v1028_v31 = vld [vmem:[%s1228_s2 + $0x70] sm:$0xff] (!%p186_p3)   ;;  %v1029_v32 = vld [vmem:[%s1228_s2 + $0x58] sm:$0xff] (!%p186_p3)  }
   0xd   : > { %v1030_v33 = vld [vmem:[%s1228_s2 + $0x78] sm:$0xff] (!%p186_p3)   ;;  %v885_v58 = vld [vmem:[%s1229_s3] ss:$0 sm:$0xff] (!%p186_p3) }
   0xe   : > { %s1236_s15 = smov (!%p217_p4, %s1045_s15), 1 }
   0xf   : > { %s888_s19 = sshll.u32 %s1236_s15, 4  ;;  %s833_s21 = sshll.u32 %s1236_s15, 3 }
  0x10   : > { %s221_s22 = scalar_lea.vmem %s1226_s0, %s888_s19  ;;  %s232_s24 = scalar_lea.vmem %s1230_s4, %s833_s21 }
  0x11   : > { %v234_v1 = vld [vmem:[%s221_s22] sm:$0xff]  ;;  %v235_v2 = vld [vmem:[%s221_s22 + $0x8] sm:$0xff] }
  0x12   : > { %v236_v3 = vpack.c.bf16 %v235_v2, %v234_v1 }
  0x14   : > { %918 = vmatpush3.bf16.msra.mxu0 %v236_v3  ;;  %924 = vmatpush3.bf16.msra.mxu1 %v236_v3 }
  0x15   : > { %941 = vmatprep.subr.bf16.mxu1 %v1055_v0  ;;  %929 = vmatprep.subr.bf16.mxu0 %v1055_v0 }
  0x17   : > { %920 = vmatmul.mubr.msk.bf16.vlgmr.msra.gmra.mrb[0].mxu0 %vm238_vm1, %v237_v4  ;;  %926 = vmatmul.mubr.msk.bf16.vlgmr.msra.gmra.mrb[0].mxu1 %vm238_vm1, %v835_v5 }
  0x18   : > { %942 = vmatpush3.bf16.msra.mxu1 %v1015_v6  ;;  %930 = vmatpush3.bf16.msra.mxu0 %v1016_v7 }
  0x19   : > { %943 = vmatprep.subr.bf16.mxu1 %v1055_v0  ;;  %931 = vmatprep.subr.bf16.mxu0 %v1055_v0 }
  0x1a   : > { %937 = vmatprep.mubr.msk.bf16.mxu0 %vm1056_vm0, %v1055_v0  ;;  %949 = vmatprep.mubr.msk.bf16.mxu1 %vm1056_vm0, %v1055_v0 }
  0x1c   : > { %944 = vmatpush3.bf16.msra.mxu1 %v1017_v8  ;;  %932 = vmatpush3.bf16.msra.mxu0 %v1018_v9 }
  0x1d   : > { %945 = vmatprep.subr.bf16.mxu1 %v1055_v0  ;;  %933 = vmatprep.subr.bf16.mxu0 %v1055_v0 }
  0x20   : > { %946 = vmatpush3.bf16.msra.mxu1 %v1019_v10  ;;  %934 = vmatpush3.bf16.msra.mxu0 %v1020_v11 }
  0x21   : > { %947 = vmatprep.subr.bf16.mxu1 %v1055_v0  ;;  %935 = vmatprep.subr.bf16.mxu0 %v1055_v0 }
  0x24   : > { %948 = vmatpush3.bf16.msra.mxu1 %v1021_v12  ;;  %936 = vmatpush3.bf16.msra.mxu0 %v1022_v13 }
  0x25   : > { %953 = vmatprep.subr.bf16.mxu1 %v1055_v0  ;;  %971 = vmatprep.subr.bf16.mxu0 %v1055_v0 }
  0xea   : > { %v276_v14 = vpop.f32.mrb[0].mxu0  ;;  %v330_v15 = vpop.f32.mrb[0].mxu1 }
  0xeb   : > { %v282_v16 = vpack.c.bf16 %v276_v14, %v276_v14  ;;  %v336_v17 = vpack.c.bf16 %v330_v15, %v330_v15  ;;  %v921_v18 = vpop.f32.mrb[1].mxu0  ;;  %v927_v19 = vpop.f32.mrb[1].mxu1 }
  0xec   : > { %v279_v20 = vpop.f32.mrb[2].mxu0  ;;  %v333_v21 = vpop.f32.mrb[2].mxu1 }
  0xed   : > { %v922_v22 = vpop.f32.mrb[3].mxu0  ;;  %v928_v23 = vpop.f32.mrb[3].mxu1  ;;  %938 = vmatmul.mubr.msk.bf16.vlgmr.msra.gmra.mrb[4].mxu0 %vm370_vm2, %v336_v17  ;;  %950 = vmatmul.mubr.msk.bf16.vlgmr.msra.gmra.mrb[4].mxu1 %vm370_vm2, %v282_v16 }
  0xee   : > { %954 = vmatpush3.bf16.msra.mxu1 %v236_v3  ;;  %972 = vmatpush3.bf16.msra.mxu0 %v236_v3 }
  0xef   : > { %955 = vmatprep.mubr.msk.bf16.mxu1 %vm1056_vm0, %v1055_v0  ;;  %973 = vmatprep.mubr.msk.bf16.mxu0 %vm1056_vm0, %v1055_v0 }
  0xf0   : > { %959 = vmatprep.subr.bf16.mxu1 %v1055_v0  ;;  %977 = vmatprep.subr.bf16.mxu0 %v1055_v0 }
  0xf5   : > { %956 = vmatmul.mubr.msk.bf16.vlgmr.msra.gmra.mrb[8].mxu1 %vm238_vm1, %v855_v24  ;;  %974 = vmatmul.mubr.msk.bf16.vlgmr.msra.gmra.mrb[8].mxu0 %vm238_vm1, %v870_v25 }
  0xf6   : > { %960 = vmatpush3.bf16.msra.mxu1 %v1023_v26  ;;  %978 = vmatpush3.bf16.msra.mxu0 %v1024_v27 }
  0xf7   : > { %961 = vmatprep.subr.bf16.mxu1 %v1055_v0  ;;  %979 = vmatprep.subr.bf16.mxu0 %v1055_v0 }
  0xf8   : > { %967 = vmatprep.mubr.msk.bf16.mxu1 %vm1056_vm0, %v1055_v0  ;;  %985 = vmatprep.mubr.msk.bf16.mxu0 %vm1056_vm0, %v1055_v0 }
  0xfa   : > { %962 = vmatpush3.bf16.msra.mxu1 %v1025_v28  ;;  %980 = vmatpush3.bf16.msra.mxu0 %v1026_v29 }
  0xfb   : > { %963 = vmatprep.subr.bf16.mxu1 %v1055_v0  ;;  %981 = vmatprep.subr.bf16.mxu0 %v1055_v0 }
  0xfe   : > { %964 = vmatpush3.bf16.msra.mxu1 %v1027_v30  ;;  %982 = vmatpush3.bf16.msra.mxu0 %v1028_v31 }
  0xff   : > { %965 = vmatprep.subr.bf16.mxu1 %v1055_v0  ;;  %983 = vmatprep.subr.bf16.mxu0 %v1055_v0 }
 0x102   : > { %966 = vmatpush3.bf16.msra.mxu1 %v1029_v32  ;;  %984 = vmatpush3.bf16.msra.mxu0 %v1030_v33 }
 0x1c0   : > { %v408_v34 = vpop.f32.mrb[4].mxu0  ;;  %v475_v35 = vpop.f32.mrb[4].mxu1 }
 0x1c1   : > { %v476_v36 = vadd.f32 %v475_v35, %v408_v34  ;;  %v939_v37 = vpop.f32.mrb[5].mxu0  ;;  %v951_v38 = vpop.f32.mrb[5].mxu1 }
 0x1c2   : > { %v411_v39 = vpop.f32.mrb[6].mxu0  ;;  %v478_v40 = vpop.f32.mrb[6].mxu1 }
 0x1c3   : > { %v940_v41 = vpop.f32.mrb[7].mxu0  ;;  %v952_v42 = vpop.f32.mrb[7].mxu1 }
 0x1c8   : > { %v520_v43 = vpop.f32.mrb[8].mxu1  ;;  %v643_v44 = vpop.f32.mrb[8].mxu0 }
 0x1c9   : > { %v526_v45 = vpack.c.bf16 %v520_v43, %v520_v43  ;;  %v649_v46 = vpack.c.bf16 %v643_v44, %v643_v44  ;;  %v957_v47 = vpop.f32.mrb[9].mxu1  ;;  %v975_v48 = vpop.f32.mrb[9].mxu0 }
 0x1ca   : > { %v523_v49 = vpop.f32.mrb[10].mxu1  ;;  %v646_v50 = vpop.f32.mrb[10].mxu0 }
 0x1cb   : > { %v958_v51 = vpop.f32.mrb[11].mxu1  ;;  %968 = vmatmul.mubr.msk.bf16.vlgmr.msra.gmra.mrb[12].mxu1 %vm370_vm2, %v526_v45  ;;  %v976_v52 = vpop.f32.mrb[11].mxu0  ;;  %986 = vmatmul.mubr.msk.bf16.vlgmr.msra.gmra.mrb[12].mxu0 %vm370_vm2, %v649_v46 }
 0x29e   : > { %v597_v53 = vpop.f32.mrb[12].mxu1  ;;  %v720_v54 = vpop.f32.mrb[12].mxu0 }
 0x29f   : > { %v603_v55 = vadd.f32 %v597_v53, %v476_v36  ;;  %v969_v56 = vpop.f32.mrb[13].mxu1  ;;  %v987_v57 = vpop.f32.mrb[13].mxu0 }
 0x2a0   : > { %v600_v59 = vpop.f32.mrb[14].mxu1  ;;  %v723_v60 = vpop.f32.mrb[14].mxu0 }
 0x2a1   : > { %v726_v61 = vadd.f32 %v720_v54, %v603_v55  ;;  %v970_v62 = vpop.f32.mrb[15].mxu1  ;;  %v988_v63 = vpop.f32.mrb[15].mxu0 }
 0x2a3   : > { %v734_v0 = vadd.f32 %v885_v58, %v726_v61 }
 0x2a5   : > { %v735_v1 = vmax.f32 %v734_v0, 0.0 }
 0x2a7   : > { %737 = vst.msk [vmem:[%s232_s24] sm:$0x7f] %vm736_vm3, %v735_v1 }
 0x2a8 PF: > { %s14_s17 = sadd.s32 1, %s1053_s17   ;;  %s1231_s15 = smov %s1049_s16 }
 0x2a9   : > { %p11_p5 = scmp.ge.s32.totalorder %s14_s17, 4   ;;  %s1232_s16 = smov %s1234_s18 }
 0x2ab   :  { %13 = sbr.rel (!%p11_p5) target bundleno = 2 (0x2), region = 75 }

</bundles_post_ra>
